<compile_context>
chip_gen: v5e
topology: v5e:2x2
jax: 0.10.0
libtpu: 0.0.40
codegen_flags: <defaults>
</compile_context>

<pallas_src>
import math

import jax
import jax.numpy as jnp
from jax import lax
from jax.experimental import pallas as pl
from jax.experimental.pallas import tpu as pltpu


def _round_up(n, m):
    return ((n + m - 1) // m) * m


def _cdiv(a, b):
    return (a + b - 1) // b


def _make_dnn_kernel(num_hidden_linears):
    """Kernel closure for a fixed depth.

    Ref order: x, (w_i, b_i) * num_hidden_linears, w_head, b_head, out.
    x is read in natural (TB, max_len) layout; activations are feature-major
    (features, TB); weights are PyTorch-layout (out, in); biases (out, 1).
    """

    def kernel(x_ref, *refs):
        out_ref = refs[-1]
        params = refs[:-1]

        x = x_ref[...]                               # (TB, in) f32

        # Layer 1: fold the transpose into the matmul -> (hid, TB) feature-major.
        w1 = params[0][...]                          # (hid, in)
        b1 = params[1][...]                          # (hid, 1)
        h = lax.dot_general(
            w1, x,
            dimension_numbers=(((1,), (1,)), ((), ())),
            preferred_element_type=jnp.float32,
        ) + b1
        h = jnp.maximum(h, 0.0)

        # Remaining hidden layers: standard (hid, hid) @ (hid, TB) MXU matmuls.
        for i in range(1, num_hidden_linears):
            w = params[2 * i][...]                   # (hid, hid)
            b = params[2 * i + 1][...]               # (hid, 1)
            h = jnp.dot(w, h, preferred_element_type=jnp.float32) + b
            h = jnp.maximum(h, 0.0)

        # Head Linear(hidden_d, 1): VPU multiply + sublane (XLU) reduce;
        # no 1-column MXU matmul.
        w_h = params[-2][...]                        # (hid, 1)
        b_h = params[-1][...]                        # (1, 1)
        out_ref[...] = jnp.sum(h * w_h, axis=0, keepdims=True) + b_h

    return kernel


def init_dnn_params(key, max_len, hidden_d, num_layers, shrink):
    """nn.Linear-style init (uniform +/- 1/sqrt(fan_in)), then * shrink.

    Hidden weights stored f32 in PyTorch layout (out, in); biases (out, 1).
    Head weight stored as an f32 (hidden_d, 1) column; head bias (1, 1).
    """
    assert num_layers >= 2
    dims = [(hidden_d, max_len)] + [(hidden_d, hidden_d)] * (num_layers - 2)
    params = []
    for (fan_out, fan_in) in dims:
        key, kw, kb = jax.random.split(key, 3)
        bound = 1.0 / math.sqrt(fan_in)
        w = jax.random.uniform(kw, (fan_out, fan_in), jnp.float32, -bound, bound)
        b = jax.random.uniform(kb, (fan_out, 1), jnp.float32, -bound, bound)
        params += [w * shrink, b * shrink]
    key, kw, kb = jax.random.split(key, 3)
    bound = 1.0 / math.sqrt(hidden_d)
    w_h = jax.random.uniform(kw, (hidden_d, 1), jnp.float32, -bound, bound)
    b_h = jax.random.uniform(kb, (1, 1), jnp.float32, -bound, bound)
    params += [w_h * shrink, b_h * shrink]
    return params


def dnn_forward(x, params, num_layers, block_b=4096):
    """Batch-tiled Pallas forward. x: (B, max_len) -> (B,)."""
    B, max_len = x.shape
    num_hidden_linears = num_layers - 1
    kernel = _make_dnn_kernel(num_hidden_linears)

    x = x.astype(jnp.float32)

    # Global preprocessing flag over the FULL (unpadded, f32) input; folded
    # into layer-1 parameters so the kernel never touches it per-element:
    #   W1_eff = (1+f)*W1,  b1_eff = b1 - f*W1.sum(axis=1, keepdims=True)
    flag = (jnp.min(x) == 0.0).astype(jnp.float32)
    w1, b1 = params[0], params[1]
    w1_eff = w1 * (1.0 + flag)
    b1_eff = b1 - flag * jnp.sum(w1, axis=1, keepdims=True)
    eff_params = [w1_eff, b1_eff] + list(params[2:])

    # Only pad tiny batches up to one lane-width; large batches are read in
    # place and ragged last blocks are handled by Pallas masking.
    if B < 128:
        x_in = jnp.pad(x, ((0, 128 - B), (0, 0)))
        B_eff = 128
    else:
        x_in = x
        B_eff = B

    # Batch tile (lane dimension): multiple of 128, <= block_b, and capped so
    # the grid has >= 2 steps when B allows (v7x megacore sharding).
    TB = max(128, min(_round_up(block_b, 128), _round_up(_cdiv(B_eff, 2), 128)))
    nb = _cdiv(B_eff, TB)

    in_specs = [pl.BlockSpec((TB, max_len), lambda i: (i, 0))]
    # Weights / biases: full block, constant index_map -> VMEM-resident.
    in_specs += [pl.BlockSpec(p.shape, lambda i: (0, 0)) for p in eff_params]

    out2d = pl.pallas_call(
        kernel,
        out_shape=jax.ShapeDtypeStruct((1, B_eff), jnp.float32),
        grid=(nb,),
        in_specs=in_specs,
        out_specs=pl.BlockSpec((1, TB), lambda i: (0, i)),
        compiler_params=pltpu.CompilerParams(
            dimension_semantics=("parallel",),
            vmem_limit_bytes=32 * 1024 * 1024,
        ),
    )(x_in, *eff_params)

    return out2d[0, :B]


def dnn_reference(x, params, num_layers):
    """Pure-JAX reference (f32 throughout, mirrors the PyTorch module)."""
    x = x.astype(jnp.float32)
    x = jnp.where(jnp.min(x) == 0.0, x * 2.0 - 1.0, x)
    h = x
    for i in range(num_layers - 1):
        w = params[2 * i]                            # (out, in)
        b = params[2 * i + 1][:, 0]                  # (out,)
        h = jnp.maximum(h @ w.T + b, 0.0)
    w_h = params[-2][:, 0]                           # (hidden_d,)
    b_h = params[-1][0, 0]
    return h @ w_h + b_h


if __name__ == "__main__":
    # DNN(max_len=32, arch="32-3", shrink=0.5)
    max_len, hidden_d, num_layers, shrink = 32, 32, 3, 0.5

    key = jax.random.PRNGKey(0)
    key, kp, kx1, kx2 = jax.random.split(key, 4)
    params = init_dnn_params(kp, max_len, hidden_d, num_layers, shrink)

    # Case 1: small batch, input min == 0 -> exercises the (x*2 - 1) fold.
    x1 = jax.random.uniform(kx1, (8, max_len), jnp.float32, 0.0, 1.0)
    x1 = x1.at[0, 0].set(0.0)
    out1 = jax.block_until_ready(dnn_forward(x1, params, num_layers))
    ref1 = dnn_reference(x1, params, num_layers)
    assert out1.shape == (8,), out1.shape
    assert jnp.allclose(out1, ref1, atol=1e-2, rtol=1e-2), (out1, ref1)

    # Case 2: larger ragged batch, min != 0 -> exercises multi-step grid
    # (2 tiles for v7x megacore) + ragged-block masking + flag=0.
    x2 = jax.random.uniform(kx2, (300, max_len), jnp.float32, 0.1, 1.0)
    out2 = jax.block_until_ready(dnn_forward(x2, params, num_layers))
    ref2 = dnn_reference(x2, params, num_layers)
    assert out2.shape == (300,), out2.shape
    assert jnp.allclose(out2, ref2, atol=1e-2, rtol=1e-2), (out2, ref2)

    print("KERNEL_OK")
</pallas_src>

<mosaic_0001>
module attributes {stable_mosaic.version = 11 : i64} {
  func.func @kernel(%arg0: i32, %arg1: memref<128x32xf32, #tpu.memory_space<vmem>>, %arg2: memref<32x32xf32, #tpu.memory_space<vmem>>, %arg3: memref<32x1xf32, #tpu.memory_space<vmem>>, %arg4: memref<32x32xf32, #tpu.memory_space<vmem>>, %arg5: memref<32x1xf32, #tpu.memory_space<vmem>>, %arg6: memref<32x1xf32, #tpu.memory_space<vmem>>, %arg7: memref<1x1xf32, #tpu.memory_space<vmem>>, %arg8: memref<1x128xf32, #tpu.memory_space<vmem>>) attributes {dimension_semantics = [#tpu.dimension_semantics<parallel>], iteration_bounds = array<i64: 1>, scalar_prefetch = 0 : i64, scratch_operands = 0 : i64, tpu.core_type = #tpu.core_type<tc>, window_params = [{transform_indices = @transform_0, window_bounds = array<i64: 128, 32>}, {pipeline_mode = #tpu.pipeline_mode<synchronous>, transform_indices = @transform_1, window_bounds = array<i64: 32, 32>}, {pipeline_mode = #tpu.pipeline_mode<synchronous>, transform_indices = @transform_2, window_bounds = array<i64: 32, 1>}, {pipeline_mode = #tpu.pipeline_mode<synchronous>, transform_indices = @transform_3, window_bounds = array<i64: 32, 32>}, {pipeline_mode = #tpu.pipeline_mode<synchronous>, transform_indices = @transform_4, window_bounds = array<i64: 32, 1>}, {pipeline_mode = #tpu.pipeline_mode<synchronous>, transform_indices = @transform_5, window_bounds = array<i64: 32, 1>}, {pipeline_mode = #tpu.pipeline_mode<synchronous>, transform_indices = @transform_6, window_bounds = array<i64: 1, 1>}, {transform_indices = @transform_7, window_bounds = array<i64: 1, 128>}]} {
    %c0 = arith.constant 0 : index
    %c0_0 = arith.constant 0 : index
    %0 = vector.load %arg1[%c0, %c0_0] : memref<128x32xf32, #tpu.memory_space<vmem>>, vector<128x32xf32>
    %c0_1 = arith.constant 0 : index
    %c0_2 = arith.constant 0 : index
    %1 = vector.load %arg2[%c0_1, %c0_2] : memref<32x32xf32, #tpu.memory_space<vmem>>, vector<32x32xf32>
    %c0_3 = arith.constant 0 : index
    %c0_4 = arith.constant 0 : index
    %2 = vector.load %arg3[%c0_3, %c0_4] : memref<32x1xf32, #tpu.memory_space<vmem>>, vector<32x1xf32>
    %cst = arith.constant dense<0.000000e+00> : vector<32x128xf32>
    %3 = tpu.matmul %1, %0, %cst {dimension_numbers = #tpu.dot_dimension_numbers<[1], [1], [0], [0], [0, 0, 1, 0], [], []>} : vector<32x32xf32>, vector<128x32xf32>, vector<32x128xf32> -> vector<32x128xf32>
    %4 = vector.broadcast %2 : vector<32x1xf32> to vector<32x128xf32>
    %5 = arith.addf %3, %4 : vector<32x128xf32>
    %cst_5 = arith.constant 0.000000e+00 : f32
    %6 = vector.broadcast %cst_5 : f32 to vector<32x128xf32>
    %7 = arith.maximumf %5, %6 : vector<32x128xf32>
    %c0_6 = arith.constant 0 : index
    %c0_7 = arith.constant 0 : index
    %8 = vector.load %arg4[%c0_6, %c0_7] : memref<32x32xf32, #tpu.memory_space<vmem>>, vector<32x32xf32>
    %c0_8 = arith.constant 0 : index
    %c0_9 = arith.constant 0 : index
    %9 = vector.load %arg5[%c0_8, %c0_9] : memref<32x1xf32, #tpu.memory_space<vmem>>, vector<32x1xf32>
    %cst_10 = arith.constant dense<0.000000e+00> : vector<32x128xf32>
    %10 = tpu.matmul %8, %7, %cst_10 {dimension_numbers = #tpu.dot_dimension_numbers<[1], [0], [0], [1], [0, 0, 1, 1], [], []>} : vector<32x32xf32>, vector<32x128xf32>, vector<32x128xf32> -> vector<32x128xf32>
    %11 = vector.broadcast %9 : vector<32x1xf32> to vector<32x128xf32>
    %12 = arith.addf %10, %11 : vector<32x128xf32>
    %cst_11 = arith.constant 0.000000e+00 : f32
    %13 = vector.broadcast %cst_11 : f32 to vector<32x128xf32>
    %14 = arith.maximumf %12, %13 : vector<32x128xf32>
    %c0_12 = arith.constant 0 : index
    %c0_13 = arith.constant 0 : index
    %15 = vector.load %arg6[%c0_12, %c0_13] : memref<32x1xf32, #tpu.memory_space<vmem>>, vector<32x1xf32>
    %c0_14 = arith.constant 0 : index
    %c0_15 = arith.constant 0 : index
    %16 = vector.load %arg7[%c0_14, %c0_15] : memref<1x1xf32, #tpu.memory_space<vmem>>, vector<1x1xf32>
    %17 = vector.broadcast %15 : vector<32x1xf32> to vector<32x128xf32>
    %18 = arith.mulf %14, %17 : vector<32x128xf32>
    %cst_16 = arith.constant dense<0.000000e+00> : vector<128xf32>
    %19 = vector.multi_reduction <add>, %18, %cst_16 [0] : vector<32x128xf32> to vector<128xf32>
    %20 = vector.shape_cast %19 : vector<128xf32> to vector<1x128xf32>
    %21 = vector.broadcast %16 : vector<1x1xf32> to vector<1x128xf32>
    %22 = arith.addf %20, %21 : vector<1x128xf32>
    %c0_17 = arith.constant 0 : index
    %c0_18 = arith.constant 0 : index
    %23 = vector.load %arg8[%c0_17, %c0_18] : memref<1x128xf32, #tpu.memory_space<vmem>>, vector<1x128xf32>
    tpu.vector_store %arg8[%c0_17, %c0_18], %22 {strides = array<i32>} : memref<1x128xf32, #tpu.memory_space<vmem>>, vector<1x128xf32>,
    return
  }
  func.func @transform_0(%arg0: i32) -> (i32, i32) {
    %c0_i32 = arith.constant 0 : i32
    %c0_i32_0 = arith.constant 0 : i32
    return %arg0, %c0_i32 : i32, i32
  }
  func.func @transform_1(%arg0: i32) -> (i32, i32) {
    %c0_i32 = arith.constant 0 : i32
    %c0_i32_0 = arith.constant 0 : i32
    %c0_i32_1 = arith.constant 0 : i32
    return %c0_i32, %c0_i32_0 : i32, i32
  }
  func.func @transform_2(%arg0: i32) -> (i32, i32) {
    %c0_i32 = arith.constant 0 : i32
    %c0_i32_0 = arith.constant 0 : i32
    %c0_i32_1 = arith.constant 0 : i32
    return %c0_i32, %c0_i32_0 : i32, i32
  }
  func.func @transform_3(%arg0: i32) -> (i32, i32) {
    %c0_i32 = arith.constant 0 : i32
    %c0_i32_0 = arith.constant 0 : i32
    %c0_i32_1 = arith.constant 0 : i32
    return %c0_i32, %c0_i32_0 : i32, i32
  }
  func.func @transform_4(%arg0: i32) -> (i32, i32) {
    %c0_i32 = arith.constant 0 : i32
    %c0_i32_0 = arith.constant 0 : i32
    %c0_i32_1 = arith.constant 0 : i32
    return %c0_i32, %c0_i32_0 : i32, i32
  }
  func.func @transform_5(%arg0: i32) -> (i32, i32) {
    %c0_i32 = arith.constant 0 : i32
    %c0_i32_0 = arith.constant 0 : i32
    %c0_i32_1 = arith.constant 0 : i32
    return %c0_i32, %c0_i32_0 : i32, i32
  }
  func.func @transform_6(%arg0: i32) -> (i32, i32) {
    %c0_i32 = arith.constant 0 : i32
    %c0_i32_0 = arith.constant 0 : i32
    %c0_i32_1 = arith.constant 0 : i32
    return %c0_i32, %c0_i32_0 : i32, i32
  }
  func.func @transform_7(%arg0: i32) -> (i32, i32) {
    %c0_i32 = arith.constant 0 : i32
    %c0_i32_0 = arith.constant 0 : i32
    return %c0_i32, %arg0 : i32, i32
  }
}

</mosaic_0001>

<bundles_post_ra>
// kernel: tpu_custom_call.1
= control target key start
LH: loop header
LB: loop body
LE: loop exit
PB: predicated region body
PF: predicated region fallthrough
CT: control target
= control target key end

     0   :  { %s601_s0 = inlined_call_operand.vmem [shape: f32[128,32], index: 0, kind: input, shape index: {}]   ;;  %s602_s1 = inlined_call_operand.vmem [shape: f32[32,32], index: 1, kind: input, shape index: {}]   ;;  %s603_s2 = inlined_call_operand.vmem [shape: f32[32,1], index: 2, kind: input, shape index: {}]   ;;  %s604_s3 = inlined_call_operand.vmem [shape: f32[32,32], index: 3, kind: input, shape index: {}]   ;;  %s605_s4 = inlined_call_operand.vmem [shape: f32[32,1], index: 4, kind: input, shape index: {}]   ;;  %s606_s5 = inlined_call_operand.vmem [shape: f32[32,1], index: 5, kind: input, shape index: {}]   ;;  %s607_s6 = inlined_call_operand.<no memory space> [shape: f32[1,1], index: 6, kind: input, shape index: {}]   ;;  %s608_s7 = inlined_call_operand.hbm [shape: f32[1,128], index: 7, kind: output, shape index: {}]  }
   0x1   :  { %v12_v0 = vstv %s607_s6 }
   0x2   :  { %13 = vst [vmem:[#allocation2] sm:$0x1] %v12_v0 }
   0x3   :  { %v44_v1 = vld [vmem:[%s601_s0 + $0x78] sm:$0xff]  ;;  %vm73_vm0 = vcmask 261120   ;;  %v43_v2 = vld [vmem:[%s601_s0 + $0x70] sm:$0xff] }
   0x4   :  { %327 = vmatpush.xpose.msk.msra.mxu3 %vm73_vm0, %v44_v1  ;;  %326 = vmatpush.xpose.msk.msra.mxu2 %vm73_vm0, %v44_v1 }
   0x5   :  { %302 = vmatpush.xpose.msk.msra.mxu0 %vm73_vm0, %v44_v1 }
   0x6   :  { %14 = vsyncpa [#allocation4], 0  ;;  %v42_v3 = vld [vmem:[%s601_s0 + $0x68] sm:$0xff]  ;;  %v41_v4 = vld [vmem:[%s601_s0 + $0x60] sm:$0xff]  ;;  %v389_v8 = vmov 0   ;;  %s293_s23 = sshll.u32 %s608_s7, 4  ;;  %s294_s23 = int_to_ptr.hbm [resolvable:$true] %s293_s23 }
   0x7   :  { %v40_v5 = vld [vmem:[%s601_s0 + $0x58] sm:$0xff]  ;;  %v39_v7 = vld [vmem:[%s601_s0 + $0x50] sm:$0xff]  ;;  %360 = vset.pattern.permute.xlu0 %v389_v8  ;;  %361 = vset.pattern.permute.xlu1 %v389_v8  ;;  %v38_v9 = vld [vmem:[%s601_s0 + $0x48] sm:$0xff] }
   0x8   :  { %329 = vmatpush.xpose.msk.msra.mxu3 %vm73_vm0, %v43_v2  ;;  %328 = vmatpush.xpose.msk.msra.mxu2 %vm73_vm0, %v43_v2  ;;  %v52_v6 = vld [vmem:[%s603_s2 + $0x18] sm:$0xff]  ;;  %v51_v10 = vld [vmem:[%s603_s2 + $0x10] sm:$0xff]  ;;  %v37_v11 = vld [vmem:[%s601_s0 + $0x40] sm:$0xff] }
   0x9   :  { %303 = vmatpush.xpose.msk.msra.mxu0 %vm73_vm0, %v43_v2  ;;  %70 = vperm.xlu0 %360, %v52_v6   ;;  %v50_v12 = vld [vmem:[%s603_s2 + $0x8] sm:$0xff]  ;;  %v36_v13 = vld [vmem:[%s601_s0 + $0x38] sm:$0xff]  ;;  %v173_v14 = vld [vmem:[%s605_s4 + $0x10] sm:$0xff] }
   0xa   :  { %362 = vset.pattern.permute.xlu2 %v389_v8  ;;  %60 = vperm.xlu1 %361, %v50_v12   ;;  %v35_v15 = vld [vmem:[%s601_s0 + $0x30] sm:$0xff]  ;;  %v49_v16 = vld [vmem:[%s603_s2] sm:$0xff]  ;;  %v34_v17 = vld [vmem:[%s601_s0 + $0x28] sm:$0xff] }
   0xb   :  { %v241_v18 = vld [vmem:[%s606_s5 + $0x8] sm:$0xff]  ;;  %v33_v19 = vld [vmem:[%s601_s0 + $0x20] sm:$0xff]  ;;  %v174_v20 = vld [vmem:[%s605_s4 + $0x18] sm:$0xff] }
   0xc   :  { %331 = vmatpush.xpose.msk.msra.mxu3 %vm73_vm0, %v42_v3  ;;  %330 = vmatpush.xpose.msk.msra.mxu2 %vm73_vm0, %v42_v3  ;;  %v32_v21 = vld [vmem:[%s601_s0 + $0x18] sm:$0xff]  ;;  %v244_v22 = vld [vmem:[#allocation2] sm:$0x1]  ;;  %v31_v23 = vld [vmem:[%s601_s0 + $0x10] sm:$0xff] }
   0xd   :  { %304 = vmatpush.xpose.msk.msra.mxu0 %vm73_vm0, %v42_v3  ;;  %v242_v24 = vld [vmem:[%s606_s5 + $0x10] sm:$0xff]  ;;  %v30_v25 = vld [vmem:[%s601_s0 + $0x8] sm:$0xff]  ;;  %v29_v26 = vld [vmem:[%s601_s0] sm:$0xff] }
   0xe   :  { %v47_v27 = vld [vmem:[%s602_s1 + $0x10] sm:$0xff]  ;;  %v46_v28 = vld [vmem:[%s602_s1 + $0x8] sm:$0xff]  ;;  %v45_v29 = vld [vmem:[%s602_s1] sm:$0xff] }
   0xf   :  { %v48_v30 = vld [vmem:[%s602_s1 + $0x18] sm:$0xff]  ;;  %v171_v31 = vld [vmem:[%s605_s4] sm:$0xff]  ;;  %v172_v35 = vld [vmem:[%s605_s4 + $0x8] sm:$0xff] }
  0x10   :  { %333 = vmatpush.xpose.msk.msra.mxu3 %vm73_vm0, %v41_v4  ;;  %332 = vmatpush.xpose.msk.msra.mxu2 %vm73_vm0, %v41_v4  ;;  %v240_v45 = vld [vmem:[%s606_s5] sm:$0xff]  ;;  %v243_v51 = vld [vmem:[%s606_s5 + $0x18] sm:$0xff]  ;;  %v168_v52 = vld [vmem:[%s604_s3 + $0x8] sm:$0xff] }
  0x11   :  { %305 = vmatpush.xpose.msk.msra.mxu0 %vm73_vm0, %v41_v4  ;;  %65 = vperm.xlu0 %360, %v51_v10   ;;  %v167_v50 = vld [vmem:[%s604_s3] sm:$0xff]  ;;  %v169_v53 = vld [vmem:[%s604_s3 + $0x10] sm:$0xff]  ;;  %v170_v54 = vld [vmem:[%s604_s3 + $0x18] sm:$0xff]  ;;  %s390_s3 = smov [#allocation3]  }
  0x12   :  { %55 = vperm.xlu1 %361, %v49_v16   ;;  %177 = vperm.xlu2 %362, %v171_v31   ;;  %s291_s5 = sshll.u32 %s390_s3, 4  ;;  %s292_s5 = int_to_ptr.vmem [resolvable:$true] %s291_s5 }
  0x14   :  { %335 = vmatpush.xpose.msk.msra.mxu3 %vm73_vm0, %v40_v5  ;;  %334 = vmatpush.xpose.msk.msra.mxu2 %vm73_vm0, %v40_v5 }
  0x15   :  { %306 = vmatpush.xpose.msk.msra.mxu0 %vm73_vm0, %v40_v5 }
  0x18   :  { %337 = vmatpush.xpose.msk.msra.mxu3 %vm73_vm0, %v39_v7  ;;  %336 = vmatpush.xpose.msk.msra.mxu2 %vm73_vm0, %v39_v7 }
  0x19   :  { %307 = vmatpush.xpose.msk.msra.mxu0 %vm73_vm0, %v39_v7  ;;  %187 = vperm.xlu0 %360, %v173_v14  }
  0x1a   :  { %192 = vperm.xlu1 %361, %v174_v20   ;;  %182 = vperm.xlu2 %362, %v172_v35  }
  0x1c   :  { %339 = vmatpush.xpose.msk.msra.mxu3 %vm73_vm0, %v38_v9  ;;  %338 = vmatpush.xpose.msk.msra.mxu2 %vm73_vm0, %v38_v9 }
  0x1d   :  { %308 = vmatpush.xpose.msk.msra.mxu0 %vm73_vm0, %v38_v9 }
  0x20   :  { %341 = vmatpush.xpose.msk.msra.mxu3 %vm73_vm0, %v37_v11  ;;  %340 = vmatpush.xpose.msk.msra.mxu2 %vm73_vm0, %v37_v11 }
  0x21   :  { %309 = vmatpush.xpose.msk.msra.mxu0 %vm73_vm0, %v37_v11  ;;  %252 = vperm.xlu0 %360, %v241_v18  }
  0x22   :  { %257 = vperm.xlu1 %361, %v242_v24   ;;  %247 = vperm.xlu2 %362, %v240_v45  }
  0x24   :  { %343 = vmatpush.xpose.msk.msra.mxu3 %vm73_vm0, %v36_v13  ;;  %342 = vmatpush.xpose.msk.msra.mxu2 %vm73_vm0, %v36_v13 }
  0x25   :  { %310 = vmatpush.xpose.msk.msra.mxu0 %vm73_vm0, %v36_v13 }
  0x28   :  { %345 = vmatpush.xpose.msk.msra.mxu3 %vm73_vm0, %v35_v15  ;;  %344 = vmatpush.xpose.msk.msra.mxu2 %vm73_vm0, %v35_v15 }
  0x29   :  { %311 = vmatpush.xpose.msk.msra.mxu0 %vm73_vm0, %v35_v15  ;;  %280 = vperm.xlu0 %360, %v244_v22  }
  0x2a   :  { %262 = vperm.xlu2 %362, %v243_v51  }
  0x2c   :  { %347 = vmatpush.xpose.msk.msra.mxu3 %vm73_vm0, %v34_v17  ;;  %346 = vmatpush.xpose.msk.msra.mxu2 %vm73_vm0, %v34_v17 }
  0x2d   :  { %312 = vmatpush.xpose.msk.msra.mxu0 %vm73_vm0, %v34_v17 }
  0x30   :  { %349 = vmatpush.xpose.msk.msra.mxu3 %vm73_vm0, %v33_v19  ;;  %348 = vmatpush.xpose.msk.msra.mxu2 %vm73_vm0, %v33_v19 }
  0x31   :  { %313 = vmatpush.xpose.msk.msra.mxu0 %vm73_vm0, %v33_v19 }
  0x34   :  { %351 = vmatpush.xpose.msk.msra.mxu3 %vm73_vm0, %v32_v21  ;;  %350 = vmatpush.xpose.msk.msra.mxu2 %vm73_vm0, %v32_v21 }
  0x35   :  { %314 = vmatpush.xpose.msk.msra.mxu0 %vm73_vm0, %v32_v21 }
  0x38   :  { %353 = vmatpush.xpose.msk.msra.mxu3 %vm73_vm0, %v31_v23  ;;  %352 = vmatpush.xpose.msk.msra.mxu2 %vm73_vm0, %v31_v23 }
  0x39   :  { %315 = vmatpush.xpose.msk.msra.mxu0 %vm73_vm0, %v31_v23 }
  0x3c   :  { %355 = vmatpush.xpose.msk.msra.mxu3 %vm73_vm0, %v30_v25  ;;  %354 = vmatpush.xpose.msk.msra.mxu2 %vm73_vm0, %v30_v25 }
  0x3d   :  { %316 = vmatpush.xpose.msk.msra.mxu0 %vm73_vm0, %v30_v25 }
  0x40   :  { %357 = vmatpush.xpose.msk.msra.mxu3 %vm73_vm0, %v29_v26  ;;  %356 = vmatpush.xpose.msk.msra.mxu2 %vm73_vm0, %v29_v26 }
  0x41   :  { %317 = vmatpush.xpose.msk.msra.mxu0 %vm73_vm0, %v29_v26 }
  0x43   :  { %320 = vmatmul.msk.f32.vlgmr.msra.gmra.mxu3 %vm73_vm0, %v47_v27  ;;  %319 = vmatmul.msk.f32.vlgmr.msra.gmra.mxu2 %vm73_vm0, %v46_v28 }
  0x44   :  { %318 = vmatmul.msk.f32.vlgmr.msra.gmra.mxu0 %vm73_vm0, %v45_v29 }
  0x4b   :  { %321 = vmatmul.msk.f32.gmra.mxu3 %vm73_vm0, %v48_v30 }
  0x6c   :  { %v178_v55 = vpop.permute.xlu2 %177 }
  0x74   :  { %v183_v57 = vpop.permute.xlu2 %182 }
  0x7b   :  { %v71_v32 = vpop.permute.xlu0 %70 }
  0x7c   :  { %v61_v34 = vpop.permute.xlu1 %60  ;;  %v248_v1 = vpop.permute.xlu2 %247 }
  0x83   :  { %v66_v36 = vpop.permute.xlu0 %65 }
  0x84   :  { %v56_v44 = vpop.permute.xlu1 %55  ;;  %v263_v14 = vpop.permute.xlu2 %262 }
  0x8b   :  { %v188_v59 = vpop.permute.xlu0 %187 }
  0x8c   :  { %v193_v60 = vpop.permute.xlu1 %192 }
  0x93   :  { %v253_v5 = vpop.permute.xlu0 %252 }
  0x94   :  { %v258_v7 = vpop.permute.xlu1 %257 }
  0x9b   :  { %v281_v22 = vpop.permute.xlu0 %280 }
  0x9c   :  { %v283_v24 = vperm.slane %v281_v22, 0 }
  0xc1   :  { %v151_v41 = vpop.f32.mrf.mxu0 }
  0xc2   :  { %v152_v47 = vadd.f32 %v151_v41, %v56_v44 }
  0xc4   :  { %v163_v49 = vmax.f32 %v152_v47, 0.0 }
  0xc6   :  { %v157_v33 = vpop.f32.mrf.mxu3  ;;  %v154_v37 = vpop.f32.mrf.mxu2 }
  0xc7   :  { %v158_v39 = vadd.f32 %v157_v33, %v66_v36  ;;  %v155_v42 = vadd.f32 %v154_v37, %v61_v34 }
  0xc9   :  { %v165_v46 = vmax.f32 %v158_v39, 0.0  ;;  %v164_v48 = vmax.f32 %v155_v42, 0.0 }
  0xce   :  { %v160_v38 = vpop.f32.mrf.mxu3 }
  0xcf   :  { %v161_v40 = vadd.f32 %v160_v38, %v71_v32 }
  0xd1   :  { %v166_v43 = vmax.f32 %v161_v40, 0.0 }
  0xd3   :  { %219 = vmatpush.msra.mxu1 %v166_v43 }
  0xd5   :  { %220 = vmatpush.msra.mxu1 %v165_v46 }
  0xd7   :  { %221 = vmatpush.msra.mxu1 %v164_v48 }
  0xd9   :  { %222 = vmatpush.msra.mxu1 %v163_v49 }
  0xda   :  { %322 = vmatmul.msk.f32.vlgmr.msra.gmra.mxu1 %vm73_vm0, %v167_v50 }
  0xe2   :  { %323 = vmatmul.msk.f32.gmra.mxu1 %vm73_vm0, %v168_v52 }
  0xea   :  { %324 = vmatmul.msk.f32.gmra.mxu1 %vm73_vm0, %v169_v53 }
  0xf2   :  { %325 = vmatmul.msk.f32.gmra.mxu1 %vm73_vm0, %v170_v54 }
 0x157   :  { %v224_v56 = vpop.f32.mrf.mxu1 }
 0x158   :  { %v225_v63 = vadd.f32 %v224_v56, %v178_v55 }
 0x15a   :  { %v236_v3 = vmax.f32 %v225_v63, 0.0 }
 0x15c   :  { %v265_v9 = vmul.f32 %v248_v1, %v236_v3 }
 0x15f   :  { %v227_v58 = vpop.f32.mrf.mxu1 }
 0x160   :  { %v228_v61 = vadd.f32 %v227_v58, %v183_v57 }
 0x162   :  { %v237_v2 = vmax.f32 %v228_v61, 0.0 }
 0x164   :  { %v266_v6 = vmul.f32 %v253_v5, %v237_v2 }
 0x166   :  { %v269_v12 = vadd.f32 %v266_v6, %v265_v9 }
 0x167   :  { %v230_v62 = vpop.f32.mrf.mxu1 }
 0x168   :  { %v231_v0 = vadd.f32 %v230_v62, %v188_v59 }
 0x16a   :  { %v238_v4 = vmax.f32 %v231_v0, 0.0 }
 0x16c   :  { %v267_v10 = vmul.f32 %v258_v7, %v238_v4 }
 0x16e   :  { %v270_v15 = vadd.f32 %v269_v12, %v267_v10 }
 0x16f   :  { %v233_v8 = vpop.f32.mrf.mxu1 }
 0x170   :  { %v234_v11 = vadd.f32 %v233_v8, %v193_v60 }
 0x172   :  { %v239_v13 = vmax.f32 %v234_v11, 0.0 }
 0x174   :  { %v268_v16 = vmul.f32 %v263_v14, %v239_v13 }
 0x176   :  { %v271_v17 = vadd.f32 %v270_v15, %v268_v16 }
 0x178   :  { %v272_v18 = vrot.slane %v271_v17, 4 }
 0x17a   :  { %v273_v19 = vadd.f32 %v272_v18, %v271_v17 }
 0x17c   :  { %v274_v20 = vrot.slane %v273_v19, 2 }
 0x17e   :  { %v275_v21 = vadd.f32 %v274_v20, %v273_v19 }
 0x180   :  { %v276_v23 = vrot.slane %v275_v21, 1 }
 0x182   :  { %v277_v25 = vadd.f32 %v276_v23, %v275_v21 }
 0x184   :  { %v284_v26 = vadd.f32 %v283_v24, %v277_v25 }
 0x186   :  { %285 = vst [vmem:[#allocation3] sm:$0x1] %v284_v26 }
 0x187   :  { %296 = dma.vmem_to_hbm [thread:$0]  %s292_s5, 16, %s294_s23, [#allocation4]  }
 0x188   :  { %387 = dma.done.wait [#allocation4], 16  }
 0x189   :  { %388 = vsyncadd [#allocation4], 4294967280 }
 0x18a   :  { %301 = vsyncpa [#allocation4], 1 }

</bundles_post_ra>
